<compile_context>
chip_gen: v6e
topology: v6e:2x2x1
jax: 0.10.0
libtpu: 0.0.40
codegen_flags: <defaults>
</compile_context>

<pallas_src>
import jax
import jax.numpy as jnp
import numpy as np
from jax.experimental import pallas as pl

# ---------------- config (small, consistent with the module) ----------------
B = 2           # batch
S = 8           # sequence length
E = 32          # embed_size
H = 4           # heads
DH = E // H     # head dim
FE = 4          # forward_expansion
HID = FE * E    # ffn hidden
LN_EPS = 1e-5
M = B * S       # rows fed to every matmul
NROW = B * H * S  # rows of the head-stacked attention operands (= 64)

# rows of the packed small-vector array (each row lane-padded to HID = 128)
R_BQKV, R_BO, R_G1, R_BE1, R_G2, R_BE2, R_B2, R_B1 = range(8)
VEC_ROWS = 8


def _layernorm(x, gamma, beta):
    mu = jnp.mean(x, axis=-1, keepdims=True)
    var = jnp.mean((x - mu) ** 2, axis=-1, keepdims=True)
    return (x - mu) * jax.lax.rsqrt(var + LN_EPS) * gamma + beta


def transformer_block_kernel(x_ref, mask_ref, w_qkv_ref, w_o_ref,
                             w1_ref, w2_ref, vec_ref, out_ref):
    x = x_ref[...]                                  # (M, 3E) = [query|key|value]
    q_in = x[:, :E]                                 # raw query (residual path)

    def vec(row, width):
        return vec_ref[row:row + 1, :width]         # (1, width)

    # ---- fused q/k/v projection: one (16,96)@(96,96) matmul ----
    # (block-diagonal weight; 1/sqrt(DH) already folded into the q block/bias)
    qkv = jnp.dot(x, w_qkv_ref[...],
                  preferred_element_type=jnp.float32) + vec(R_BQKV, 3 * E)

    # ---- stack heads along rows: (M, E) -> (H*M, DH), row order (h, b, s) ----
    def stack_heads(t):                             # t: (M, E)
        return jnp.concatenate(
            [t[:, h * DH:(h + 1) * DH] for h in range(H)], axis=0)

    qs = stack_heads(qkv[:, 0 * E:1 * E])           # (64, 8)
    ks = stack_heads(qkv[:, 1 * E:2 * E])           # (64, 8)
    vs = stack_heads(qkv[:, 2 * E:3 * E])           # (64, 8)

    # ---- block-diagonal attention: one score matmul + one dense softmax ----
    s = jnp.einsum("md,nd->mn", qs, ks,
                   preferred_element_type=jnp.float32) + mask_ref[...]  # (64,64)
    s = s - jnp.max(s, axis=-1, keepdims=True)
    p = jnp.exp(s)
    p = p * pl.reciprocal(jnp.sum(p, axis=-1, keepdims=True), approx=True)
    ctx_s = jnp.dot(p, vs, preferred_element_type=jnp.float32)          # (64, 8)

    # ---- unstack heads back onto lanes: (H*M, DH) -> (M, E) ----
    ctx = jnp.concatenate(
        [ctx_s[h * M:(h + 1) * M, :] for h in range(H)], axis=-1)       # (16,32)

    # ---- output projection + residual + norm1 (dropout p=0 -> identity) ----
    attn = jnp.dot(ctx, w_o_ref[...],
                   preferred_element_type=jnp.float32) + vec(R_BO, E)
    x1 = _layernorm(attn + q_in, vec(R_G1, E), vec(R_BE1, E))

    # ---- feed forward ----
    h1 = jnp.dot(x1, w1_ref[...],
                 preferred_element_type=jnp.float32) + vec(R_B1, HID)
    h1 = jnp.maximum(h1, 0.0)
    ff = jnp.dot(h1, w2_ref[...],
                 preferred_element_type=jnp.float32) + vec(R_B2, E)

    # ---- residual + norm2 (dropout p=0 -> identity) ----
    out = _layernorm(ff + x1, vec(R_G2, E), vec(R_BE2, E))
    out_ref[...] = out.astype(out_ref.dtype)


def pack_params(params):
    """One-time (outside jit): fold the softmax scale into wq/bq, build the
    block-diagonal fused QKV weight, and pack all small vectors."""
    (wq, bq, wk, bk, wv, bv, wo, bo,
     g1, be1, g2, be2, w1, b1, w2, b2) = params
    scale = 1.0 / (DH ** 0.5)
    z = jnp.zeros((E, E), jnp.float32)
    w_qkv = jnp.concatenate([
        jnp.concatenate([wq * scale, z, z], axis=1),
        jnp.concatenate([z, wk, z], axis=1),
        jnp.concatenate([z, z, wv], axis=1)], axis=0)            # (3E, 3E)
    b_qkv = jnp.concatenate([bq * scale, bk, bv], axis=-1)       # (1, 3E)

    def row(v):   # lane-pad a (1, w) vector to (1, HID)
        return jnp.pad(v, ((0, 0), (0, HID - v.shape[-1])))

    vecs = jnp.concatenate(
        [row(b_qkv), row(bo), row(g1), row(be1),
         row(g2), row(be2), row(b2), b1], axis=0)                # (8, HID)
    return w_qkv, wo, w1, w2, vecs


_COST = pl.CostEstimate(
    flops=2 * (M * (3 * E) * (3 * E)        # fused qkv projection
               + NROW * DH * NROW           # scores
               + NROW * NROW * DH           # context
               + M * E * E                  # output projection
               + M * E * HID + M * HID * E),  # ffn
    transcendentals=NROW * NROW + NROW + 2 * M,
    bytes_accessed=4 * (M * 3 * E + NROW * NROW + (3 * E) ** 2 + E * E
                        + 2 * E * HID + VEC_ROWS * HID + M * E),
)


@jax.jit
def transformer_block(value, key, query, mask, packed):
    w_qkv, w_o, w1, w2, vecs = packed
    # pre-concatenate / pre-flatten activations (kernel stays 2-D throughout)
    x_cat = jnp.concatenate([query, key, value], axis=-1).reshape(M, 3 * E)
    # expand the (S,S) additive mask to the (B*H*S, B*H*S) block-diagonal
    # attention mask; cross-head / cross-batch blocks get a finite -1e9.
    eye = jnp.eye(H * B, dtype=jnp.float32)
    blocks = jnp.kron(eye, jnp.ones((S, S), jnp.float32))
    bigmask = jnp.kron(eye, mask.astype(jnp.float32)) + (1.0 - blocks) * (-1e9)
    # No grid: the whole problem (~100 KB) lives in VMEM in one invocation.
    out2d = pl.pallas_call(
        transformer_block_kernel,
        out_shape=jax.ShapeDtypeStruct((M, E), jnp.float32),
        cost_estimate=_COST,
    )(x_cat, bigmask, w_qkv, w_o, w1, w2, vecs)
    return out2d.reshape(B, S, E)


# ------------------------- pure-JAX reference ---------------------------
def reference(value, key, query, mask, params):
    (wq, bq, wk, bk, wv, bv, wo, bo,
     g1, be1, g2, be2, w1, b1, w2, b2) = params
    qp = query @ wq + bq
    kp = key @ wk + bk
    vp = value @ wv + bv

    def split(x):  # (B,S,E) -> (B,H,S,DH)
        return x.reshape(B, S, H, DH).transpose(0, 2, 1, 3)

    qh, kh, vh = split(qp), split(kp), split(vp)
    s = jnp.einsum("bhqd,bhkd->bhqk", qh, kh) / (DH ** 0.5) + mask
    p = jax.nn.softmax(s, axis=-1)
    ctx = jnp.einsum("bhqk,bhkd->bhqd", p, vh).transpose(0, 2, 1, 3).reshape(B, S, E)
    attn = ctx @ wo + bo
    x = _layernorm(attn + query, g1, be1)
    ff = jnp.maximum(x @ w1 + b1, 0.0) @ w2 + b2
    return _layernorm(ff + x, g2, be2)


if __name__ == "__main__":
    root = jax.random.PRNGKey(0)
    keys = jax.random.split(root, 16)

    def w(k, shape, scale=0.05):
        return (scale * jax.random.normal(k, shape)).astype(jnp.float32)

    # parameters (deterministic). Linear weights stored pre-transposed: (in, out)
    params = (
        w(keys[0], (E, E)), w(keys[1], (1, E)),       # q proj
        w(keys[2], (E, E)), w(keys[3], (1, E)),       # k proj
        w(keys[4], (E, E)), w(keys[5], (1, E)),       # v proj
        w(keys[6], (E, E)), w(keys[7], (1, E)),       # out proj
        jnp.ones((1, E), jnp.float32), jnp.zeros((1, E), jnp.float32),   # ln1
        jnp.ones((1, E), jnp.float32), jnp.zeros((1, E), jnp.float32),   # ln2
        w(keys[8], (E, HID)), w(keys[9], (1, HID)),   # ffn layer 1
        w(keys[10], (HID, E)), w(keys[11], (1, E)),   # ffn layer 2
    )

    value = jax.random.normal(keys[12], (B, S, E), jnp.float32)
    key_t = jax.random.normal(keys[13], (B, S, E), jnp.float32)
    query = jax.random.normal(keys[14], (B, S, E), jnp.float32)

    # causal additive float mask (finite large negative, as torch float masks)
    causal = jnp.tril(jnp.ones((S, S), jnp.float32))
    mask = jnp.where(causal == 1.0, 0.0, -1e9).astype(jnp.float32)

    packed = pack_params(params)   # one-time constant fold / packing

    out = transformer_block(value, key_t, query, mask, packed)
    out = jax.block_until_ready(out)

    ref = reference(value, key_t, query, mask, params)
    # slightly looser tolerance than 1e-4 because of pl.reciprocal(approx=True)
    np.testing.assert_allclose(np.asarray(out), np.asarray(ref),
                               rtol=2e-3, atol=2e-3)
    print("KERNEL_OK")
</pallas_src>

<mosaic_0001>
module attributes {stable_mosaic.version = 11 : i64} {
  func.func @transformer_block_kernel(%arg0: memref<16x96xf32, #tpu.memory_space<vmem>>, %arg1: memref<64x64xf32, #tpu.memory_space<vmem>>, %arg2: memref<96x96xf32, #tpu.memory_space<vmem>>, %arg3: memref<32x32xf32, #tpu.memory_space<vmem>>, %arg4: memref<32x128xf32, #tpu.memory_space<vmem>>, %arg5: memref<128x32xf32, #tpu.memory_space<vmem>>, %arg6: memref<8x128xf32, #tpu.memory_space<vmem>>, %arg7: memref<16x32xf32, #tpu.memory_space<vmem>>) attributes {dimension_semantics = [], scalar_prefetch = 0 : i64, scratch_operands = 0 : i64, tpu.core_type = #tpu.core_type<tc>} {
    %c0 = arith.constant 0 : index
    %c0_0 = arith.constant 0 : index
    %0 = vector.load %arg0[%c0, %c0_0] : memref<16x96xf32, #tpu.memory_space<vmem>>, vector<16x96xf32>
    %1 = vector.extract_strided_slice %0 {offsets = [0, 0], sizes = [16, 32], strides = [1, 1]} : vector<16x96xf32> to vector<16x32xf32>
    %c0_1 = arith.constant 0 : index
    %c0_2 = arith.constant 0 : index
    %2 = vector.load %arg2[%c0_1, %c0_2] : memref<96x96xf32, #tpu.memory_space<vmem>>, vector<96x96xf32>
    %cst = arith.constant dense<0.000000e+00> : vector<16x96xf32>
    %3 = tpu.matmul %0, %2, %cst {dimension_numbers = #tpu.dot_dimension_numbers<[1], [0], [0], [1], [0, 0, 1, 1], [], []>} : vector<16x96xf32>, vector<96x96xf32>, vector<16x96xf32> -> vector<16x96xf32>
    %c0_3 = arith.constant 0 : index
    %c0_4 = arith.constant 0 : index
    %4 = vector.load %arg6[%c0_3, %c0_4] : memref<8x128xf32, #tpu.memory_space<vmem>>, vector<1x96xf32>
    %5 = vector.broadcast %4 : vector<1x96xf32> to vector<16x96xf32>
    %6 = arith.addf %3, %5 : vector<16x96xf32>
    %7 = vector.extract_strided_slice %6 {offsets = [0, 0], sizes = [16, 32], strides = [1, 1]} : vector<16x96xf32> to vector<16x32xf32>
    %8 = vector.extract_strided_slice %7 {offsets = [0, 0], sizes = [16, 8], strides = [1, 1]} : vector<16x32xf32> to vector<16x8xf32>
    %9 = vector.extract_strided_slice %7 {offsets = [0, 8], sizes = [16, 8], strides = [1, 1]} : vector<16x32xf32> to vector<16x8xf32>
    %10 = vector.extract_strided_slice %7 {offsets = [0, 16], sizes = [16, 8], strides = [1, 1]} : vector<16x32xf32> to vector<16x8xf32>
    %11 = vector.extract_strided_slice %7 {offsets = [0, 24], sizes = [16, 8], strides = [1, 1]} : vector<16x32xf32> to vector<16x8xf32>
    %12 = tpu.concatenate %8, %9, %10, %11 in 0 : vector<16x8xf32>, vector<16x8xf32>, vector<16x8xf32>, vector<16x8xf32> -> vector<64x8xf32>
    %13 = vector.extract_strided_slice %6 {offsets = [0, 32], sizes = [16, 32], strides = [1, 1]} : vector<16x96xf32> to vector<16x32xf32>
    %14 = vector.extract_strided_slice %13 {offsets = [0, 0], sizes = [16, 8], strides = [1, 1]} : vector<16x32xf32> to vector<16x8xf32>
    %15 = vector.extract_strided_slice %13 {offsets = [0, 8], sizes = [16, 8], strides = [1, 1]} : vector<16x32xf32> to vector<16x8xf32>
    %16 = vector.extract_strided_slice %13 {offsets = [0, 16], sizes = [16, 8], strides = [1, 1]} : vector<16x32xf32> to vector<16x8xf32>
    %17 = vector.extract_strided_slice %13 {offsets = [0, 24], sizes = [16, 8], strides = [1, 1]} : vector<16x32xf32> to vector<16x8xf32>
    %18 = tpu.concatenate %14, %15, %16, %17 in 0 : vector<16x8xf32>, vector<16x8xf32>, vector<16x8xf32>, vector<16x8xf32> -> vector<64x8xf32>
    %19 = vector.extract_strided_slice %6 {offsets = [0, 64], sizes = [16, 32], strides = [1, 1]} : vector<16x96xf32> to vector<16x32xf32>
    %20 = vector.extract_strided_slice %19 {offsets = [0, 0], sizes = [16, 8], strides = [1, 1]} : vector<16x32xf32> to vector<16x8xf32>
    %21 = vector.extract_strided_slice %19 {offsets = [0, 8], sizes = [16, 8], strides = [1, 1]} : vector<16x32xf32> to vector<16x8xf32>
    %22 = vector.extract_strided_slice %19 {offsets = [0, 16], sizes = [16, 8], strides = [1, 1]} : vector<16x32xf32> to vector<16x8xf32>
    %23 = vector.extract_strided_slice %19 {offsets = [0, 24], sizes = [16, 8], strides = [1, 1]} : vector<16x32xf32> to vector<16x8xf32>
    %24 = tpu.concatenate %20, %21, %22, %23 in 0 : vector<16x8xf32>, vector<16x8xf32>, vector<16x8xf32>, vector<16x8xf32> -> vector<64x8xf32>
    "tpu.trace_start"() <{level = 10 : i32, message = "md,nd->mn"}> : () -> ()
    %cst_5 = arith.constant dense<0.000000e+00> : vector<64x64xf32>
    %25 = tpu.matmul %12, %18, %cst_5 {dimension_numbers = #tpu.dot_dimension_numbers<[1], [1], [0], [0], [0, 0, 1, 0], [], []>} : vector<64x8xf32>, vector<64x8xf32>, vector<64x64xf32> -> vector<64x64xf32>
    "tpu.trace_stop"() : () -> ()
    %c0_6 = arith.constant 0 : index
    %c0_7 = arith.constant 0 : index
    %26 = vector.load %arg1[%c0_6, %c0_7] : memref<64x64xf32, #tpu.memory_space<vmem>>, vector<64x64xf32>
    %27 = arith.addf %25, %26 : vector<64x64xf32>
    %cst_8 = arith.constant dense<0xFF800000> : vector<64xf32>
    %28 = vector.multi_reduction <maximumf>, %27, %cst_8 [1] : vector<64x64xf32> to vector<64xf32>
    %29 = vector.shape_cast %28 : vector<64xf32> to vector<64x1xf32>
    %30 = vector.broadcast %29 : vector<64x1xf32> to vector<64x64xf32>
    %31 = arith.subf %27, %30 : vector<64x64xf32>
    %32 = math.exp %31 : vector<64x64xf32>
    %cst_9 = arith.constant dense<0.000000e+00> : vector<64xf32>
    %33 = vector.multi_reduction <add>, %32, %cst_9 [1] : vector<64x64xf32> to vector<64xf32>
    %34 = vector.shape_cast %33 : vector<64xf32> to vector<64x1xf32>
    %35 = tpu.reciprocal %34 {approx = true} : vector<64x1xf32> -> vector<64x1xf32>
    %36 = vector.broadcast %35 : vector<64x1xf32> to vector<64x64xf32>
    %37 = arith.mulf %32, %36 : vector<64x64xf32>
    %cst_10 = arith.constant dense<0.000000e+00> : vector<64x8xf32>
    %38 = tpu.matmul %37, %24, %cst_10 {dimension_numbers = #tpu.dot_dimension_numbers<[1], [0], [0], [1], [0, 0, 1, 1], [], []>} : vector<64x64xf32>, vector<64x8xf32>, vector<64x8xf32> -> vector<64x8xf32>
    %39 = vector.extract_strided_slice %38 {offsets = [0, 0], sizes = [16, 8], strides = [1, 1]} : vector<64x8xf32> to vector<16x8xf32>
    %40 = vector.extract_strided_slice %38 {offsets = [16, 0], sizes = [16, 8], strides = [1, 1]} : vector<64x8xf32> to vector<16x8xf32>
    %41 = vector.extract_strided_slice %38 {offsets = [32, 0], sizes = [16, 8], strides = [1, 1]} : vector<64x8xf32> to vector<16x8xf32>
    %42 = vector.extract_strided_slice %38 {offsets = [48, 0], sizes = [16, 8], strides = [1, 1]} : vector<64x8xf32> to vector<16x8xf32>
    %43 = tpu.concatenate %39, %40, %41, %42 in 1 : vector<16x8xf32>, vector<16x8xf32>, vector<16x8xf32>, vector<16x8xf32> -> vector<16x32xf32>
    %c0_11 = arith.constant 0 : index
    %c0_12 = arith.constant 0 : index
    %44 = vector.load %arg3[%c0_11, %c0_12] : memref<32x32xf32, #tpu.memory_space<vmem>>, vector<32x32xf32>
    %cst_13 = arith.constant dense<0.000000e+00> : vector<16x32xf32>
    %45 = tpu.matmul %43, %44, %cst_13 {dimension_numbers = #tpu.dot_dimension_numbers<[1], [0], [0], [1], [0, 0, 1, 1], [], []>} : vector<16x32xf32>, vector<32x32xf32>, vector<16x32xf32> -> vector<16x32xf32>
    %c1 = arith.constant 1 : index
    %c0_14 = arith.constant 0 : index
    %46 = vector.load %arg6[%c1, %c0_14] : memref<8x128xf32, #tpu.memory_space<vmem>>, vector<1x32xf32>
    %47 = vector.broadcast %46 : vector<1x32xf32> to vector<16x32xf32>
    %48 = arith.addf %45, %47 : vector<16x32xf32>
    %49 = arith.addf %48, %1 : vector<16x32xf32>
    %c2 = arith.constant 2 : index
    %c0_15 = arith.constant 0 : index
    %50 = vector.load %arg6[%c2, %c0_15] : memref<8x128xf32, #tpu.memory_space<vmem>>, vector<1x32xf32>
    %c3 = arith.constant 3 : index
    %c0_16 = arith.constant 0 : index
    %51 = vector.load %arg6[%c3, %c0_16] : memref<8x128xf32, #tpu.memory_space<vmem>>, vector<1x32xf32>
    %cst_17 = arith.constant dense<0.000000e+00> : vector<16xf32>
    %52 = vector.multi_reduction <add>, %49, %cst_17 [1] : vector<16x32xf32> to vector<16xf32>
    %53 = vector.shape_cast %52 : vector<16xf32> to vector<16x1xf32>
    %cst_18 = arith.constant 3.200000e+01 : f32
    %54 = vector.broadcast %cst_18 : f32 to vector<16x1xf32>
    %55 = arith.divf %53, %54 : vector<16x1xf32>
    %56 = vector.broadcast %55 : vector<16x1xf32> to vector<16x32xf32>
    %57 = arith.subf %49, %56 : vector<16x32xf32>
    %58 = arith.mulf %57, %57 : vector<16x32xf32>
    %cst_19 = arith.constant dense<0.000000e+00> : vector<16xf32>
    %59 = vector.multi_reduction <add>, %58, %cst_19 [1] : vector<16x32xf32> to vector<16xf32>
    %60 = vector.shape_cast %59 : vector<16xf32> to vector<16x1xf32>
    %cst_20 = arith.constant 3.200000e+01 : f32
    %61 = vector.broadcast %cst_20 : f32 to vector<16x1xf32>
    %62 = arith.divf %60, %61 : vector<16x1xf32>
    %63 = vector.broadcast %55 : vector<16x1xf32> to vector<16x32xf32>
    %64 = arith.subf %49, %63 : vector<16x32xf32>
    %cst_21 = arith.constant 9.99999974E-6 : f32
    %65 = vector.broadcast %cst_21 : f32 to vector<16x1xf32>
    %66 = arith.addf %62, %65 : vector<16x1xf32>
    %67 = math.rsqrt %66 : vector<16x1xf32>
    %68 = vector.broadcast %67 : vector<16x1xf32> to vector<16x32xf32>
    %69 = arith.mulf %64, %68 : vector<16x32xf32>
    %70 = vector.broadcast %50 : vector<1x32xf32> to vector<16x32xf32>
    %71 = arith.mulf %69, %70 : vector<16x32xf32>
    %72 = vector.broadcast %51 : vector<1x32xf32> to vector<16x32xf32>
    %73 = arith.addf %71, %72 : vector<16x32xf32>
    %c0_22 = arith.constant 0 : index
    %c0_23 = arith.constant 0 : index
    %74 = vector.load %arg4[%c0_22, %c0_23] : memref<32x128xf32, #tpu.memory_space<vmem>>, vector<32x128xf32>
    %cst_24 = arith.constant dense<0.000000e+00> : vector<16x128xf32>
    %75 = tpu.matmul %73, %74, %cst_24 {dimension_numbers = #tpu.dot_dimension_numbers<[1], [0], [0], [1], [0, 0, 1, 1], [], []>} : vector<16x32xf32>, vector<32x128xf32>, vector<16x128xf32> -> vector<16x128xf32>
    %c7 = arith.constant 7 : index
    %c0_25 = arith.constant 0 : index
    %76 = vector.load %arg6[%c7, %c0_25] : memref<8x128xf32, #tpu.memory_space<vmem>>, vector<1x128xf32>
    %77 = vector.broadcast %76 : vector<1x128xf32> to vector<16x128xf32>
    %78 = arith.addf %75, %77 : vector<16x128xf32>
    %cst_26 = arith.constant 0.000000e+00 : f32
    %79 = vector.broadcast %cst_26 : f32 to vector<16x128xf32>
    %80 = arith.maximumf %78, %79 : vector<16x128xf32>
    %c0_27 = arith.constant 0 : index
    %c0_28 = arith.constant 0 : index
    %81 = vector.load %arg5[%c0_27, %c0_28] : memref<128x32xf32, #tpu.memory_space<vmem>>, vector<128x32xf32>
    %cst_29 = arith.constant dense<0.000000e+00> : vector<16x32xf32>
    %82 = tpu.matmul %80, %81, %cst_29 {dimension_numbers = #tpu.dot_dimension_numbers<[1], [0], [0], [1], [0, 0, 1, 1], [], []>} : vector<16x128xf32>, vector<128x32xf32>, vector<16x32xf32> -> vector<16x32xf32>
    %c6 = arith.constant 6 : index
    %c0_30 = arith.constant 0 : index
    %83 = vector.load %arg6[%c6, %c0_30] : memref<8x128xf32, #tpu.memory_space<vmem>>, vector<1x32xf32>
    %84 = vector.broadcast %83 : vector<1x32xf32> to vector<16x32xf32>
    %85 = arith.addf %82, %84 : vector<16x32xf32>
    %86 = arith.addf %85, %73 : vector<16x32xf32>
    %c4 = arith.constant 4 : index
    %c0_31 = arith.constant 0 : index
    %87 = vector.load %arg6[%c4, %c0_31] : memref<8x128xf32, #tpu.memory_space<vmem>>, vector<1x32xf32>
    %c5 = arith.constant 5 : index
    %c0_32 = arith.constant 0 : index
    %88 = vector.load %arg6[%c5, %c0_32] : memref<8x128xf32, #tpu.memory_space<vmem>>, vector<1x32xf32>
    %cst_33 = arith.constant dense<0.000000e+00> : vector<16xf32>
    %89 = vector.multi_reduction <add>, %86, %cst_33 [1] : vector<16x32xf32> to vector<16xf32>
    %90 = vector.shape_cast %89 : vector<16xf32> to vector<16x1xf32>
    %cst_34 = arith.constant 3.200000e+01 : f32
    %91 = vector.broadcast %cst_34 : f32 to vector<16x1xf32>
    %92 = arith.divf %90, %91 : vector<16x1xf32>
    %93 = vector.broadcast %92 : vector<16x1xf32> to vector<16x32xf32>
    %94 = arith.subf %86, %93 : vector<16x32xf32>
    %95 = arith.mulf %94, %94 : vector<16x32xf32>
    %cst_35 = arith.constant dense<0.000000e+00> : vector<16xf32>
    %96 = vector.multi_reduction <add>, %95, %cst_35 [1] : vector<16x32xf32> to vector<16xf32>
    %97 = vector.shape_cast %96 : vector<16xf32> to vector<16x1xf32>
    %cst_36 = arith.constant 3.200000e+01 : f32
    %98 = vector.broadcast %cst_36 : f32 to vector<16x1xf32>
    %99 = arith.divf %97, %98 : vector<16x1xf32>
    %100 = vector.broadcast %92 : vector<16x1xf32> to vector<16x32xf32>
    %101 = arith.subf %86, %100 : vector<16x32xf32>
    %cst_37 = arith.constant 9.99999974E-6 : f32
    %102 = vector.broadcast %cst_37 : f32 to vector<16x1xf32>
    %103 = arith.addf %99, %102 : vector<16x1xf32>
    %104 = math.rsqrt %103 : vector<16x1xf32>
    %105 = vector.broadcast %104 : vector<16x1xf32> to vector<16x32xf32>
    %106 = arith.mulf %101, %105 : vector<16x32xf32>
    %107 = vector.broadcast %87 : vector<1x32xf32> to vector<16x32xf32>
    %108 = arith.mulf %106, %107 : vector<16x32xf32>
    %109 = vector.broadcast %88 : vector<1x32xf32> to vector<16x32xf32>
    %110 = arith.addf %108, %109 : vector<16x32xf32>
    %c0_38 = arith.constant 0 : index
    %c0_39 = arith.constant 0 : index
    %111 = vector.load %arg7[%c0_38, %c0_39] : memref<16x32xf32, #tpu.memory_space<vmem>>, vector<16x32xf32>
    tpu.vector_store %arg7[%c0_38, %c0_39], %110 {strides = array<i32>} : memref<16x32xf32, #tpu.memory_space<vmem>>, vector<16x32xf32>,
    return
  }
}

</mosaic_0001>

<bundles_post_ra>
// kernel: transformer_block.1
= control target key start
LH: loop header
LB: loop body
LE: loop exit
PB: predicated region body
PF: predicated region fallthrough
CT: control target
= control target key end

     0   :  { %vm46_vm0 = vcmask 785408   ;;  %s1666_s0 = inlined_call_operand.vmem [shape: f32[16,96], index: 0, kind: input, shape index: {}]   ;;  %s1667_s1 = inlined_call_operand.vmem [shape: f32[64,64], index: 1, kind: input, shape index: {}]   ;;  %s1668_s2 = inlined_call_operand.vmem [shape: f32[96,96], index: 2, kind: input, shape index: {}]   ;;  %s1669_s3 = inlined_call_operand.vmem [shape: f32[32,32], index: 3, kind: input, shape index: {}]   ;;  %s1670_s4 = inlined_call_operand.vmem [shape: f32[32,128], index: 4, kind: input, shape index: {}]   ;;  %s1671_s5 = inlined_call_operand.vmem [shape: f32[128,32], index: 5, kind: input, shape index: {}]   ;;  %s1672_s6 = inlined_call_operand.vmem [shape: f32[8,128], index: 6, kind: input, shape index: {}]   ;;  %s1673_s7 = inlined_call_operand.hbm [shape: f32[16,32], index: 7, kind: output, shape index: {}]  }
   0x1   :  { %v40_v0 = vld [vmem:[%s1668_s2 + $0x58] sm:$0xff]  ;;  %v39_v1 = vld [vmem:[%s1668_s2 + $0x50] sm:$0xff]  ;;  %v38_v2 = vld [vmem:[%s1668_s2 + $0x48] sm:$0xff] }
   0x2   :  { %1074 = vmatprep.subr.mxu0 %v40_v0  ;;  %v37_v3 = vld [vmem:[%s1668_s2 + $0x40] sm:$0xff] }
   0x3   :  { %1075 = vmatpush3.msra.mxu0 %v40_v0  ;;  %v1351_v4 = vld [vmem:[%s1666_s0] sm:$0xff] }
   0x4   :  { %1076 = vmatprep.subr.mxu0 %v39_v1 }
   0x5   :  { %1077 = vmatpush3.msra.mxu0 %v39_v1 }
   0x6   :  { %12 = vsyncpa [#allocation3], 0  ;;  %1078 = vmatprep.subr.mxu0 %v38_v2  ;;  %1098 = vmatprep.mubr.msk.f32.mxu0 %vm46_vm0, %v1351_v4  ;;  %v36_v5 = vld [vmem:[%s1668_s2 + $0x38] sm:$0xff]  ;;  %v35_v6 = vld [vmem:[%s1668_s2 + $0x30] sm:$0xff]  ;;  %vm166_vm1 = vcmask 64512   ;;  %s1288_s8 = smov 120  }
   0x7   :  { %1079 = vmatpush3.msra.mxu0 %v38_v2  ;;  %v34_v7 = vld [vmem:[%s1668_s2 + $0x28] sm:$0xff]  ;;  %v33_v8 = vld [vmem:[%s1668_s2 + $0x20] sm:$0xff]  ;;  %v32_v9 = vld [vmem:[%s1668_s2 + $0x18] sm:$0xff]  ;;  %s1289_s9 = smov 96   ;;  %vm304_vm2 = vcmask 523264   ;;  %s1290_s24 = smov 64  }
   0x8   :  { %1080 = vmatprep.subr.mxu0 %v37_v3  ;;  %v31_v10 = vld [vmem:[%s1668_s2 + $0x10] sm:$0xff]  ;;  %v30_v11 = vld [vmem:[%s1668_s2 + $0x8] sm:$0xff]  ;;  %v29_v12 = vld [vmem:[%s1668_s2] sm:$0xff]  ;;  %s1286_s2 = smov 112   ;;  %s1292_s10 = smov 16   ;;  %vm572_vm3 = vcmask 130048  }
   0x9   :  { %1081 = vmatpush3.msra.mxu0 %v37_v3  ;;  %v1382_v13 = vld [vmem:[%s1666_s0 + $0x8] sm:$0xff]  ;;  %v960_v14 = vld [vmem:[%s1672_s6] ss:$0 sm:$0xff]  ;;  %s1287_s0 = smov 104   ;;  %v144_v41 = vld [vmem:[%s1667_s1 + $0x10] sm:$0xff]  ;;  %s1293_s11 = smov 24  }
   0xa   :  { %1082 = vmatprep.subr.mxu0 %v36_v5  ;;  %v143_v33 = vld [vmem:[%s1667_s1 + $0x8] sm:$0xff]  ;;  %v142_v35 = vld [vmem:[%s1667_s1] sm:$0xff]  ;;  %v145_v43 = vld [vmem:[%s1667_s1 + $0x18] sm:$0xff]  ;;  %vm575_vm4 = vcmask 195584   ;;  %vm587_vm5 = vcmask 261120  }
   0xb   :  { %1083 = vmatpush3.msra.mxu0 %v36_v5  ;;  %v146_v47 = vld [vmem:[%s1667_s1 + $0x20] sm:$0xff]  ;;  %v147_v50 = vld [vmem:[%s1667_s1 + $0x28] sm:$0xff]  ;;  %v149_v56 = vld [vmem:[%s1667_s1 + $0x38] sm:$0xff] }
   0xc   :  { %1084 = vmatprep.subr.mxu0 %v35_v6  ;;  %v148_v62 = vld [vmem:[%s1667_s1 + $0x30] sm:$0xff] }
   0xd   :  { %1085 = vmatpush3.msra.mxu0 %v35_v6 }
   0xe   :  { %1086 = vmatprep.subr.mxu0 %v34_v7 }
   0xf   :  { %1087 = vmatpush3.msra.mxu0 %v34_v7 }
  0x10   :  { %1088 = vmatprep.subr.mxu0 %v33_v8 }
  0x11   :  { %1089 = vmatpush3.msra.mxu0 %v33_v8 }
  0x12   :  { %1090 = vmatprep.subr.mxu0 %v32_v9 }
  0x13   :  { %1091 = vmatpush3.msra.mxu0 %v32_v9 }
  0x14   :  { %1092 = vmatprep.subr.mxu0 %v31_v10 }
  0x15   :  { %1093 = vmatpush3.msra.mxu0 %v31_v10 }
  0x16   :  { %1094 = vmatprep.subr.mxu0 %v30_v11 }
  0x17   :  { %1095 = vmatpush3.msra.mxu0 %v30_v11 }
  0x18   :  { %1096 = vmatprep.subr.mxu0 %v29_v12 }
  0x19   :  { %1097 = vmatpush3.msra.mxu0 %v29_v12 }
  0x1a   :  { %1099 = vmatmul.mubr.msk.f32.vlgmr.msra.gmra.mxu0 %vm46_vm0, %v1382_v13 }
  0xda   :  { %v1100_v15 = vpop.f32.mrf.mxu0 }
  0xdb   :  { %v1389_v16 = vadd.f32 %v1100_v15, %v960_v14 }
  0xdc   :  { %v119_v17 = vpop.f32.mrf.mxu0 }
  0xdd   :  { %v1391_v18 = vadd.f32 %v960_v14, %v119_v17  ;;  %136 = vrot.lane.b32.xlu1 %v1389_v16, %s1286_s2  ;;  %140 = vrot.lane.b32.xlu0 %v1389_v16, %s1287_s0 }
  0xdf   :  { %1117 = vmatprep.mubr.msk.f32.mxu1 %vm166_vm1, %v1391_v18 }
  0xe1   :  { %134 = vrot.lane.b32.xlu1 %v1391_v18, %s1286_s2  ;;  %138 = vrot.lane.b32.xlu0 %v1391_v18, %s1287_s0 }
  0xe5   :  { %130 = vrot.lane.b32.xlu1 %v1391_v18, %s1288_s8  ;;  %132 = vrot.lane.b32.xlu0 %v1389_v16, %s1288_s8 }
 0x14f   :  { %v1401_v19 = vpop.permute.xlu1 %136  ;;  %v1403_v20 = vpop.permute.xlu0 %140 }
 0x150   :  { %164 = vrot.lane.b32.xlu0 %v1403_v20, %s1289_s9 }
 0x153   :  { %v1406_v21 = vpop.permute.xlu0 %138  ;;  %v1410_v22 = vpop.permute.xlu1 %134 }
 0x154   :  { %160 = vrot.lane.b32.xlu0 %v1401_v19, %s1289_s9  ;;  %162 = vrot.lane.b32.xlu1 %v1406_v21, %s1289_s9 }
 0x157   :  { %v1412_v23 = vpop.permute.xlu0 %132  ;;  %v1416_v24 = vpop.permute.xlu1 %130 }
 0x158   :  { %158 = vrot.lane.b32.xlu1 %v1410_v22, %s1289_s9  ;;  %156 = vrot.lane.b32.xlu0 %v1412_v23, %s1289_s9 }
 0x15c   :  { %154 = vrot.lane.b32.xlu1 %v1416_v24, %s1289_s9  ;;  %152 = vrot.lane.b32.xlu0 %v1389_v16, %s1289_s9 }
 0x160   :  { %150 = vrot.lane.b32.xlu1 %v1391_v18, %s1289_s9  ;;  %s1291_s9 = smov 8  }
 0x1c2   :  { %v165_v25 = vpop.permute.xlu0 %164 }
 0x1c3   :  { %1101 = vmatprep.subr.msk.mxu1 %vm166_vm1, %v165_v25 }
 0x1c4   :  { %1102 = vmatpush3.xpose.msk.msra.mxu1 %vm166_vm1, %v165_v25 }
 0x1c6   :  { %v163_v26 = vpop.permute.xlu1 %162  ;;  %v161_v27 = vpop.permute.xlu0 %160 }
 0x1c7   :  { %1103 = vmatprep.subr.msk.mxu1 %vm166_vm1, %v163_v26 }
 0x1c8   :  { %1104 = vmatpush3.xpose.msk.msra.mxu1 %vm166_vm1, %v163_v26 }
 0x1c9   :  { %1105 = vmatprep.subr.msk.mxu1 %vm166_vm1, %v161_v27 }
 0x1ca   :  { %v159_v28 = vpop.permute.xlu1 %158  ;;  %v157_v29 = vpop.permute.xlu0 %156 }
 0x1cc   :  { %1106 = vmatpush3.xpose.msk.msra.mxu1 %vm166_vm1, %v161_v27 }
 0x1cd   :  { %1107 = vmatprep.subr.msk.mxu1 %vm166_vm1, %v159_v28 }
 0x1ce   :  { %v155_v30 = vpop.permute.xlu1 %154  ;;  %v153_v31 = vpop.permute.xlu0 %152 }
 0x1d0   :  { %1108 = vmatpush3.xpose.msk.msra.mxu1 %vm166_vm1, %v159_v28 }
 0x1d1   :  { %1109 = vmatprep.subr.msk.mxu1 %vm166_vm1, %v157_v29 }
 0x1d2   :  { %v151_v32 = vpop.permute.xlu1 %150 }
 0x1d4   :  { %1110 = vmatpush3.xpose.msk.msra.mxu1 %vm166_vm1, %v157_v29 }
 0x1d5   :  { %1111 = vmatprep.subr.msk.mxu1 %vm166_vm1, %v155_v30 }
 0x1d8   :  { %1112 = vmatpush3.xpose.msk.msra.mxu1 %vm166_vm1, %v155_v30 }
 0x1d9   :  { %1113 = vmatprep.subr.msk.mxu1 %vm166_vm1, %v153_v31 }
 0x1dc   :  { %1114 = vmatpush3.xpose.msk.msra.mxu1 %vm166_vm1, %v153_v31 }
 0x1dd   :  { %1115 = vmatprep.subr.msk.mxu1 %vm166_vm1, %v151_v32 }
 0x1e0   :  { %1116 = vmatpush3.xpose.msk.msra.mxu1 %vm166_vm1, %v151_v32 }
 0x1e3   :  { %1118 = vmatmul.mubr.msk.f32.vlgmr.msra.gmra.mxu1 %vm166_vm1, %v1389_v16 }
 0x1e4   :  { %1120 = vmatprep.mubr.msk.f32.mxu1 %vm166_vm1, %v1416_v24 }
 0x1e7   :  { %1121 = vmatmul.mubr.msk.f32.gmra.mxu1 %vm166_vm1, %v1412_v23 }
 0x1e8   :  { %1123 = vmatprep.mubr.msk.f32.mxu1 %vm166_vm1, %v1410_v22 }
 0x1eb   :  { %1124 = vmatmul.mubr.msk.f32.gmra.mxu1 %vm166_vm1, %v1401_v19 }
 0x1ec   :  { %1126 = vmatprep.mubr.msk.f32.mxu1 %vm166_vm1, %v1406_v21 }
 0x1ef   :  { %1127 = vmatmul.mubr.msk.f32.gmra.mxu1 %vm166_vm1, %v1403_v20 }
 0x2a3   :  { %v1119_v34 = vpop.f32.mrf.mxu1 }
 0x2a4   :  { %v271_v36 = vadd.f32 %v1119_v34, %v143_v33 }
 0x2a5   :  { %v265_v37 = vpop.f32.mrf.mxu1 }
 0x2a6   :  { %v266_v38 = vadd.f32 %v265_v37, %v142_v35  ;;  %v308_v39 = vsel %vm304_vm2, %v271_v36, -inf }
 0x2a7   :  { %309 = vmax.xlane.f32.xlu1 %v308_v39  ;;  %v1122_v40 = vpop.f32.mrf.mxu1 }
 0x2a8   :  { %v305_v42 = vsel %vm304_vm2, %v266_v38, -inf  ;;  %v281_v48 = vadd.f32 %v1122_v40, %v145_v43 }
 0x2a9   :  { %v275_v44 = vpop.f32.mrf.mxu1  ;;  %306 = vmax.xlane.f32.xlu0 %v305_v42 }
 0x2aa   :  { %v276_v45 = vadd.f32 %v275_v44, %v144_v41  ;;  %v314_v55 = vsel %vm304_vm2, %v281_v48, -inf }
 0x2ab   :  { %v1125_v46 = vpop.f32.mrf.mxu1 }
 0x2ac   :  { %v311_v49 = vsel %vm304_vm2, %v276_v45, -inf  ;;  %v291_v53 = vadd.f32 %v1125_v46, %v147_v50 }
 0x2ad   :  { %v285_v51 = vpop.f32.mrf.mxu1  ;;  %312 = vmax.xlane.f32.xlu0 %v311_v49 }
 0x2ae   :  { %v286_v52 = vadd.f32 %v285_v51, %v146_v47  ;;  %v320_v59 = vsel %vm304_vm2, %v291_v53, -inf }
 0x2af   :  { %v1128_v57 = vpop.f32.mrf.mxu1 }
 0x2b0   :  { %v317_v54 = vsel %vm304_vm2, %v286_v52, -inf  ;;  %v301_v58 = vadd.f32 %v1128_v57, %v149_v56 }
 0x2b1   :  { %318 = vmax.xlane.f32.xlu1 %v317_v54  ;;  %315 = vmax.xlane.f32.xlu0 %v314_v55  ;;  %v295_v61 = vpop.f32.mrf.mxu1 }
 0x2b2   :  { %v326_v60 = vsel %vm304_vm2, %v301_v58, -inf  ;;  %v1490_v63 = vadd.f32 %v295_v61, %v148_v62 }
 0x2b4   :  { %v323_v0 = vsel %vm304_vm2, %v1490_v63, -inf }
 0x2b5   :  { %321 = vmax.xlane.f32.xlu0 %v320_v59 }
 0x2b9   :  { %327 = vmax.xlane.f32.xlu0 %v326_v60 }
 0x2c2   :  { %407 = vrot.lane.b32.xlu1 %v1403_v20, %s1290_s24 }
 0x2c6   :  { %403 = vrot.lane.b32.xlu1 %v1401_v19, %s1290_s24 }
 0x2cf   :  { %405 = vrot.lane.b32.xlu0 %v1406_v21, %s1290_s24 }
 0x2d3   :  { %399 = vrot.lane.b32.xlu0 %v1412_v23, %s1290_s24 }
 0x2ea   :  { %324 = vmax.xlane.f32.xlu1 %v323_v0 }
 0x2fb   :  { %401 = vrot.lane.b32.xlu1 %v1410_v22, %s1290_s24 }
 0x2ff   :  { %397 = vrot.lane.b32.xlu1 %v1416_v24, %s1290_s24 }
 0x330   :  { %v310_v1 = vpop.xlane.xlu1 %309 }
 0x331   :  { %v330_v2 = vsub.f32 %v271_v36, %v310_v1 }
 0x332   :  { %v307_v3 = vpop.xlane.xlu0 %306 }
 0x333   :  { %v339_v5 = vmul.f32 1.442695, %v330_v2  ;;  %v329_v6 = vsub.f32 %v266_v38, %v307_v3 }
 0x335   :  { %1224 = vpow2.f32 %v339_v5  ;;  %v337_v7 = vmul.f32 1.442695, %v329_v6 }
 0x336   :  { %v313_v8 = vpop.xlane.xlu0 %312 }
 0x337   :  { %1226 = vpow2.f32 %v337_v7  ;;  %v331_v9 = vsub.f32 %v276_v45, %v313_v8 }
 0x339   :  { %v341_v10 = vmul.f32 1.442695, %v331_v9 }
 0x33a   :  { %v319_v11 = vpop.xlane.xlu1 %318  ;;  %v316_v12 = vpop.xlane.xlu0 %315 }
 0x33b   :  { %1228 = vpow2.f32 %v341_v10  ;;  %v333_v14 = vsub.f32 %v286_v52, %v319_v11  ;;  %v332_v15 = vsub.f32 %v281_v48, %v316_v12  ;;  %v581_v12 = vld [vmem:[%s1669_s3 + $0x18] sm:$0xff] }
 0x33d   :  { %v345_v17 = vmul.f32 1.442695, %v333_v14  ;;  %v343_v19 = vmul.f32 1.442695, %v332_v15  ;;  %v580_v14 = vld [vmem:[%s1669_s3 + $0x10] sm:$0xff]  ;;  %v579_v15 = vld [vmem:[%s1669_s3 + $0x8] sm:$0xff] }
 0x33e   :  { %v408_v20 = vpop.permute.xlu1 %407  ;;  %v322_v21 = vpop.xlane.xlu0 %321 }
 0x33f   :  { %1230 = vpow2.f32 %v345_v17  ;;  %v334_v22 = vsub.f32 %v291_v53, %v322_v21  ;;  %1129 = vmatprep.subr.mxu0 %v408_v20  ;;  %v578_v17 = vld [vmem:[%s1669_s3] sm:$0xff] }
 0x340   :  { %1232 = vpow2.f32 %v343_v19  ;;  %1130 = vmatpush3.msra.mxu0 %v408_v20 }
 0x341   :  { %v347_v23 = vmul.f32 1.442695, %v334_v22 }
 0x342   :  { %v1498_v24 = vpop.eup %1224  ;;  %v328_v25 = vpop.xlane.xlu0 %327 }
 0x343   :  { %1234 = vpow2.f32 %v347_v23  ;;  %v336_v26 = vsub.f32 %v301_v58, %v328_v25  ;;  %v356_v27 = vsel %vm304_vm2, %v1498_v24, 0.0  ;;  %v404_v33 = vpop.permute.xlu1 %403 }
 0x344   :  { %v1227_v28 = vpop.eup %1226  ;;  %357 = vadd.xlane.f32.xlu0 %v356_v27 }
 0x345   :  { %v351_v29 = vmul.f32 1.442695, %v336_v26  ;;  %v353_v30 = vsel %vm304_vm2, %v1227_v28, 0.0 }
 0x346   :  { %354 = vadd.xlane.f32.xlu1 %v353_v30  ;;  %v406_v31 = vpop.permute.xlu0 %405 }
 0x347   :  { %1236 = vpow2.f32 %v351_v29  ;;  %1131 = vmatprep.subr.mxu0 %v406_v31 }
 0x348   :  { %v1503_v32 = vpop.eup %1228  ;;  %1132 = vmatpush3.msra.mxu0 %v406_v31 }
 0x349   :  { %1133 = vmatprep.subr.mxu0 %v404_v33  ;;  %v359_v34 = vsel %vm304_vm2, %v1503_v32, 0.0 }
 0x34a   :  { %360 = vadd.xlane.f32.xlu1 %v359_v34  ;;  %1134 = vmatpush3.msra.mxu0 %v404_v33  ;;  %v400_v47 = vpop.permute.xlu0 %399 }
 0x34c   :  { %v1507_v35 = vpop.eup %1230 }
 0x34d   :  { %v1233_v36 = vpop.eup %1232  ;;  %v365_v37 = vsel %vm304_vm2, %v1507_v35, 0.0 }
 0x34e   :  { %366 = vadd.xlane.f32.xlu1 %v365_v37  ;;  %v362_v38 = vsel %vm304_vm2, %v1233_v36, 0.0 }
 0x34f   :  { %363 = vadd.xlane.f32.xlu0 %v362_v38 }
 0x350   :  { %v1512_v39 = vpop.eup %1234 }
 0x351   :  { %v368_v40 = vsel %vm304_vm2, %v1512_v39, 0.0 }
 0x353   :  { %369 = vadd.xlane.f32.xlu0 %v368_v40 }
 0x354   :  { %v1516_v41 = vpop.eup %1236 }
 0x355   :  { %v374_v42 = vsel %vm304_vm2, %v1516_v41, 0.0 }
 0x357   :  { %375 = vadd.xlane.f32.xlu0 %v374_v42 }
 0x36d   :  { %395 = vrot.lane.b32.xlu0 %v1389_v16, %s1290_s24 }
 0x373   :  { %v325_v43 = vpop.xlane.xlu1 %324 }
 0x374   :  { %v335_v44 = vsub.f32 %v1490_v63, %v325_v43 }
 0x376   :  { %v349_v45 = vmul.f32 1.442695, %v335_v44 }
 0x377   :  { %v402_v46 = vpop.permute.xlu1 %401 }
 0x378   :  { %1238 = vpow2.f32 %v349_v45  ;;  %1135 = vmatprep.subr.mxu0 %v402_v46 }
 0x379   :  { %1136 = vmatpush3.msra.mxu0 %v402_v46 }
 0x37a   :  { %1137 = vmatprep.subr.mxu0 %v400_v47 }
 0x37b   :  { %v398_v48 = vpop.permute.xlu1 %397  ;;  %1138 = vmatpush3.msra.mxu0 %v400_v47 }
 0x37c   :  { %1139 = vmatprep.subr.mxu0 %v398_v48 }
 0x37d   :  { %1140 = vmatpush3.msra.mxu0 %v398_v48 }
 0x385   :  { %v1239_v49 = vpop.eup %1238 }
 0x386   :  { %v371_v50 = vsel %vm304_vm2, %v1239_v49, 0.0 }
 0x387   :  { %372 = vadd.xlane.f32.xlu1 %v371_v50 }
 0x398   :  { %393 = vrot.lane.b32.xlu1 %v1391_v18, %s1290_s24 }
 0x3cd   :  { %v358_v51 = vpop.xlane.xlu0 %357 }
 0x3cf   :  { %v355_v16 = vpop.xlane.xlu1 %354 }
 0x3d0   :  { %1240 = vrcp.f32 %v355_v16 }
 0x3d1   :  { %1242 = vrcp.f32 %v358_v51 }
 0x3d3   :  { %v361_v58 = vpop.xlane.xlu1 %360 }
 0x3d4   :  { %1244 = vrcp.f32 %v361_v58  ;;  %v712_v58 = vld [vmem:[%s1670_s4] sm:$0xff] }
 0x3d7   :  { %v367_v59 = vpop.xlane.xlu1 %366 }
 0x3d8   :  { %v364_v52 = vpop.xlane.xlu0 %363 }
 0x3d9   :  { %1246 = vrcp.f32 %v364_v52 }
 0x3da   :  { %1248 = vrcp.f32 %v367_v59  ;;  %v819_v59 = vld [vmem:[%s1671_s5 + $0x78] sm:$0xff] }
 0x3db   :  { %1179 = vmatprep.subr.mxu1 %v819_v59 }
 0x3dc   :  { %v370_v53 = vpop.xlane.xlu0 %369  ;;  %1180 = vmatpush3.msra.mxu1 %v819_v59 }
 0x3dd   :  { %v1241_v54 = vpop.eup %1240  ;;  %1250 = vrcp.f32 %v370_v53 }
 0x3de   :  { %v385_v55 = vmul.f32 %v1241_v54, %v1227_v28  ;;  %v1243_v60 = vpop.eup %1242 }
 0x3df   :  { %v386_v63 = vmul.f32 %v1243_v60, %v1498_v24  ;;  %v817_v60 = vld [vmem:[%s1671_s5 + $0x68] sm:$0xff] }
 0x3e0   :  { %v376_v56 = vpop.xlane.xlu0 %375  ;;  %1145 = vmatprep.mubr.msk.f32.mxu0 %vm304_vm2, %v385_v55  ;;  %v715_v55 = vld [vmem:[%s1670_s4 + $0x18] sm:$0xff] }
 0x3e1   :  { %1252 = vrcp.f32 %v376_v56  ;;  %v1245_v61 = vpop.eup %1244  ;;  %v714_v56 = vld [vmem:[%s1670_s4 + $0x10] sm:$0xff] }
 0x3e2   :  { %v387_v1 = vmul.f32 %v1245_v61, %v1503_v32  ;;  %v816_v61 = vld [vmem:[%s1671_s5 + $0x60] sm:$0xff] }
 0x3e4   :  { %v396_v57 = vpop.permute.xlu0 %395 }
 0x3e5   :  { %1141 = vmatprep.subr.mxu0 %v396_v57 }
 0x3e6   :  { %1142 = vmatpush3.msra.mxu0 %v396_v57  ;;  %v1247_v0 = vpop.eup %1246  ;;  %v713_v57 = vld [vmem:[%s1670_s4 + $0x8] sm:$0xff] }
 0x3e7   :  { %v1249_v2 = vpop.eup %1248  ;;  %v388_v3 = vmul.f32 %v1247_v0, %v1233_v36  ;;  %v813_v0 = vld [vmem:[%s1671_s5 + $0x48] sm:$0xff] }
 0x3e8   :  { %v389_v6 = vmul.f32 %v1249_v2, %v1507_v35  ;;  %v811_v2 = vld [vmem:[%s1671_s5 + $0x38] sm:$0xff] }
 0x3ea   :  { %v1251_v5 = vpop.eup %1250 }
 0x3eb   :  { %v390_v8 = vmul.f32 %v1251_v5, %v1512_v39  ;;  %v987_v39 = vld [vmem:[%s1672_s6 + $0x1] ss:$0 sm:$0xff]  ;;  %v809_v5 = vld [vmem:[%s1671_s5 + $0x28] sm:$0xff] }
 0x3ee   :  { %v1253_v7 = vpop.eup %1252 }
 0x3ef   :  { %v392_v11 = vmul.f32 %v1253_v7, %v1516_v41 }
 0x410   :  { %v373_v18 = vpop.xlane.xlu1 %372 }
 0x411   :  { %1254 = vrcp.f32 %v373_v18  ;;  %v818_v18 = vld [vmem:[%s1671_s5 + $0x70] sm:$0xff] }
 0x412   :  { %1181 = vmatprep.subr.mxu1 %v818_v18 }
 0x413   :  { %1182 = vmatpush3.msra.mxu1 %v818_v18  ;;  %v996_v18 = vld [vmem:[%s1672_s6 + $0x4] ss:$0 sm:$0xff] }
 0x414   :  { %v394_v62 = vpop.permute.xlu1 %393  ;;  %1183 = vmatprep.subr.mxu1 %v817_v60 }
 0x415   :  { %1143 = vmatprep.subr.mxu0 %v394_v62  ;;  %1184 = vmatpush3.msra.mxu1 %v817_v60 }
 0x416   :  { %1144 = vmatpush3.msra.mxu0 %v394_v62  ;;  %v815_v62 = vld [vmem:[%s1671_s5 + $0x58] sm:$0xff]  ;;  %1185 = vmatprep.subr.mxu1 %v816_v61 }
 0x417   :  { %1146 = vmatmul.mubr.msk.f32.vlgmr.msra.gmra.mxu0 %vm304_vm2, %v386_v63  ;;  %1157 = vmatprep.subr.mxu0 %v581_v12  ;;  %v814_v63 = vld [vmem:[%s1671_s5 + $0x50] sm:$0xff] }
 0x418   :  { %1148 = vmatprep.mubr.msk.f32.mxu0 %vm304_vm2, %v387_v1  ;;  %1158 = vmatpush3.msra.mxu0 %v581_v12  ;;  %v812_v1 = vld [vmem:[%s1671_s5 + $0x40] sm:$0xff] }
 0x419   :  { %1159 = vmatprep.subr.mxu0 %v580_v14  ;;  %1186 = vmatpush3.msra.mxu1 %v816_v61 }
 0x41a   :  { %1160 = vmatpush3.msra.mxu0 %v580_v14  ;;  %1187 = vmatprep.subr.mxu1 %v815_v62 }
 0x41b   :  { %1149 = vmatmul.mubr.msk.f32.gmra.mxu0 %vm304_vm2, %v388_v3  ;;  %1161 = vmatprep.subr.mxu0 %v579_v15  ;;  %v810_v3 = vld [vmem:[%s1671_s5 + $0x30] sm:$0xff] }
 0x41c   :  { %1151 = vmatprep.mubr.msk.f32.mxu0 %vm304_vm2, %v389_v6  ;;  %1162 = vmatpush3.msra.mxu0 %v579_v15  ;;  %v808_v6 = vld [vmem:[%s1671_s5 + $0x20] sm:$0xff] }
 0x41d   :  { %1163 = vmatprep.subr.mxu0 %v578_v17  ;;  %1188 = vmatpush3.msra.mxu1 %v815_v62  ;;  %v990_v15 = vld [vmem:[%s1672_s6 + $0x2] ss:$0 sm:$0xff]  ;;  %v997_v62 = vld [vmem:[%s1672_s6 + $0x5] ss:$0 sm:$0xff] }
 0x41e   :  { %v1255_v9 = vpop.eup %1254  ;;  %1164 = vmatpush3.msra.mxu0 %v578_v17  ;;  %1189 = vmatprep.subr.mxu1 %v814_v63 }
 0x41f   :  { %1152 = vmatmul.mubr.msk.f32.gmra.mxu0 %vm304_vm2, %v390_v8  ;;  %v391_v10 = vmul.f32 %v1255_v9, %v1239_v49  ;;  %1168 = vmatprep.subr.mxu0 %v715_v55 }
 0x420   :  { %1190 = vmatpush3.msra.mxu1 %v814_v63 }
 0x421   :  { %1154 = vmatprep.mubr.msk.f32.mxu0 %vm304_vm2, %v391_v10  ;;  %1191 = vmatprep.subr.mxu1 %v813_v0 }
 0x422   :  { %1192 = vmatpush3.msra.mxu1 %v813_v0 }
 0x423   :  { %1155 = vmatmul.mubr.msk.f32.gmra.mxu0 %vm304_vm2, %v392_v11  ;;  %1193 = vmatprep.subr.mxu1 %v812_v1 }
 0x424   :  { %1194 = vmatpush3.msra.mxu1 %v812_v1 }
 0x425   :  { %1195 = vmatprep.subr.mxu1 %v811_v2 }
 0x426   :  { %1196 = vmatpush3.msra.mxu1 %v811_v2 }
 0x427   :  { %1197 = vmatprep.subr.mxu1 %v810_v3 }
 0x428   :  { %1198 = vmatpush3.msra.mxu1 %v810_v3 }
 0x429   :  { %1199 = vmatprep.subr.mxu1 %v809_v5 }
 0x42a   :  { %1200 = vmatpush3.msra.mxu1 %v809_v5 }
 0x42b   :  { %1201 = vmatprep.subr.mxu1 %v808_v6 }
 0x42c   :  { %1202 = vmatpush3.msra.mxu1 %v808_v6 }
 0x4d7   :  { %v1147_v19 = vpop.f32.mrf.mxu0 }
 0x4d9   :  { %v507_v20 = vpop.f32.mrf.mxu0 }
 0x4db   :  { %v1150_v21 = vpop.f32.mrf.mxu0 }
 0x4dc   :  { %550 = vrot.lane.b32.xlu1 %v1150_v21, %s1291_s9 }
 0x4dd   :  { %v517_v22 = vpop.f32.mrf.mxu0 }
 0x4de   :  { %548 = vrot.lane.b32.xlu0 %v517_v22, %s1291_s9 }
 0x4df   :  { %v1153_v23 = vpop.f32.mrf.mxu0 }
 0x4e0   :  { %558 = vrot.lane.b32.xlu1 %v1153_v23, %s1292_s10 }
 0x4e1   :  { %v527_v24 = vpop.f32.mrf.mxu0 }
 0x4e2   :  { %556 = vrot.lane.b32.xlu0 %v527_v24, %s1292_s10 }
 0x4e3   :  { %v1156_v25 = vpop.f32.mrf.mxu0 }
 0x4e4   :  { %566 = vrot.lane.b32.xlu1 %v1156_v25, %s1293_s11 }
 0x4e5   :  { %v537_v26 = vpop.f32.mrf.mxu0 }
 0x4e6   :  { %564 = vrot.lane.b32.xlu0 %v537_v26, %s1293_s11  ;;  %v807_v26 = vld [vmem:[%s1671_s5 + $0x18] sm:$0xff]  ;;  %s1294_s11 = smov [#allocation2]  }
 0x4e7   :  { %1203 = vmatprep.subr.mxu1 %v807_v26  ;;  %s949_s3 = sshll.u32 %s1294_s11, 4  ;;  %s950_s3 = int_to_ptr.vmem [resolvable:$true] %s949_s3 }
 0x4e8   :  { %1204 = vmatpush3.msra.mxu1 %v807_v26  ;;  %s1264_s12 = scalar_lea.vmem %s950_s3, 256  ;;  %p1269_p1 = scmp.lt.s32.totalorder %s950_s3, %s950_s3 }
 0x4e9   :  { %p1265_p0 = scmp.ne.s32.totalorder %s950_s3, %s1264_s12  ;;  %p1270_p2 = scmp.lt.s32.totalorder %s1264_s12, %s1264_s12 }
 0x4eb   :  { %p1271_p3 = por %p1270_p2, %p1269_p1 }
 0x4ed   :  { %p1272_p4 = pnand %p1271_p3, %p1265_p0 }
 0x54e   :  { %v551_v27 = vpop.permute.xlu1 %550 }
 0x54f   :  { %v571_v33 = vsel %vm166_vm1, %v1147_v19, %v551_v27  ;;  %v991_v19 = vld [vmem:[%s1672_s6 + $0x3] ss:$0 sm:$0xff]  ;;  %v806_v27 = vld [vmem:[%s1671_s5 + $0x10] sm:$0xff] }
 0x550   :  { %v549_v28 = vpop.permute.xlu0 %548  ;;  %1205 = vmatprep.subr.mxu1 %v806_v27 }
 0x551   :  { %v570_v31 = vsel %vm166_vm1, %v507_v20, %v549_v28  ;;  %1206 = vmatpush3.msra.mxu1 %v806_v27  ;;  %v805_v28 = vld [vmem:[%s1671_s5 + $0x8] sm:$0xff] }
 0x552   :  { %v559_v29 = vpop.permute.xlu1 %558  ;;  %1207 = vmatprep.subr.mxu1 %v805_v28 }
 0x553   :  { %v574_v36 = vsel %vm572_vm3, %v571_v33, %v559_v29  ;;  %v804_v29 = vld [vmem:[%s1671_s5] sm:$0xff]  ;;  %1208 = vmatpush3.msra.mxu1 %v805_v28 }
 0x554   :  { %v557_v30 = vpop.permute.xlu0 %556  ;;  %1209 = vmatprep.subr.mxu1 %v804_v29 }
 0x555   :  { %v573_v34 = vsel %vm572_vm3, %v570_v31, %v557_v30  ;;  %1210 = vmatpush3.msra.mxu1 %v804_v29  ;;  %v992_v30 = vld [vmem:[%s1672_s6 + $0x7] ss:$0 sm:$0xff] }
 0x556   :  { %v567_v32 = vpop.permute.xlu1 %566 }
 0x557   :  { %v577_v38 = vsel %vm575_vm4, %v574_v36, %v567_v32 }
 0x558   :  { %v565_v35 = vpop.permute.xlu0 %564 }
 0x559   :  { %v576_v37 = vsel %vm575_vm4, %v573_v34, %v565_v35 }
 0x55a   :  { %1165 = vmatprep.mubr.msk.f32.mxu0 %vm587_vm5, %v576_v37  ;;  %v995_v37 = vld [vmem:[%s1672_s6 + $0x6] ss:$0 sm:$0xff] }
 0x55b   :  { %1166 = vmatmul.mubr.msk.f32.vlgmr.msra.gmra.mxu0 %vm587_vm5, %v577_v38 }
 0x55c   :  { %1169 = vmatpush3.msra.mxu0 %v715_v55 }
 0x55d   :  { %1170 = vmatprep.subr.mxu0 %v714_v56 }
 0x55e   :  { %1171 = vmatpush3.msra.mxu0 %v714_v56 }
 0x55f   :  { %1172 = vmatprep.subr.mxu0 %v713_v57 }
 0x560   :  { %1173 = vmatpush3.msra.mxu0 %v713_v57 }
 0x561   :  { %1174 = vmatprep.subr.mxu0 %v712_v58 }
 0x562   :  { %1175 = vmatpush3.msra.mxu0 %v712_v58 }
 0x61b   :  { %v1167_v40 = vpop.f32.mrf.mxu0 }
 0x61c   :  { %v666_v41 = vadd.f32 %v1167_v40, %v987_v39 }
 0x61d   :  { %v660_v42 = vpop.f32.mrf.mxu0 }
 0x61e   :  { %v661_v43 = vadd.f32 %v987_v39, %v660_v42  ;;  %v670_v44 = vadd.f32 %v666_v41, %v1382_v13 }
 0x620   :  { %v676_v45 = vsel %vm587_vm5, %v670_v44, 0.0  ;;  %v669_v46 = vadd.f32 %v661_v43, %v1351_v4 }
 0x621   :  { %677 = vadd.xlane.f32.xlu1 %v676_v45 }
 0x622   :  { %v673_v47 = vsel %vm587_vm5, %v669_v46, 0.0 }
 0x623   :  { %674 = vadd.xlane.f32.xlu0 %v673_v47 }
 0x6aa   :  { %v678_v48 = vpop.xlane.xlu1 %677 }
 0x6ab   :  { %v681_v49 = vmul.f32 0.03125, %v678_v48 }
 0x6ac   :  { %v675_v50 = vpop.xlane.xlu0 %674 }
 0x6ad   :  { %v680_v16 = vmul.f32 0.03125, %v675_v50  ;;  %v1564_v51 = vsub.f32 %v670_v44, %v681_v49 }
 0x6af   :  { %v1566_v52 = vsub.f32 %v669_v46, %v680_v16  ;;  %v685_v4 = vmul.f32 %v1564_v51, %v1564_v51 }
 0x6b1   :  { %v684_v53 = vmul.f32 %v1566_v52, %v1566_v52  ;;  %v689_v54 = vsel %vm587_vm5, %v685_v4, 0.0 }
 0x6b3   :  { %v686_v13 = vsel %vm587_vm5, %v684_v53, 0.0 }
 0x6b4   :  { %687 = vadd.xlane.f32.xlu0 %v686_v13 }
 0x6b8   :  { %690 = vadd.xlane.f32.xlu0 %v689_v54 }
 0x73d   :  { %v688_v7 = vpop.xlane.xlu0 %687 }
 0x73e   :  { %v692_v8 = vmul.f32 0.03125, %v688_v7 }
 0x740   :  { %v694_v9 = vadd.f32 1e-05, %v692_v8 }
 0x741   :  { %v691_v10 = vpop.xlane.xlu0 %690 }
 0x742   :  { %1256 = vrsqrt.f32 %v694_v9  ;;  %v693_v11 = vmul.f32 0.03125, %v691_v10 }
 0x744   :  { %v695_v12 = vadd.f32 1e-05, %v693_v11 }
 0x746   :  { %1258 = vrsqrt.f32 %v695_v12 }
 0x74f   :  { %v1257_v14 = vpop.eup %1256 }
 0x750   :  { %v698_v17 = vmul.f32 %v1257_v14, %v1566_v52 }
 0x752   :  { %v704_v20 = vmul.f32 %v990_v15, %v698_v17 }
 0x753   :  { %v1259_v21 = vpop.eup %1258 }
 0x754   :  { %v699_v22 = vmul.f32 %v1259_v21, %v1564_v51  ;;  %v710_v23 = vadd.f32 %v991_v19, %v704_v20 }
 0x756   :  { %v705_v24 = vmul.f32 %v990_v15, %v699_v22  ;;  %1176 = vmatprep.mubr.msk.f32.mxu0 %vm587_vm5, %v710_v23 }
 0x758   :  { %v711_v25 = vadd.f32 %v991_v19, %v705_v24 }
 0x75a   :  { %1177 = vmatmul.mubr.msk.f32.vlgmr.msra.gmra.mxu0 %vm587_vm5, %v711_v25 }
 0x81a   :  { %v1178_v31 = vpop.f32.mrf.mxu0 }
 0x81b   :  { %v799_v32 = vadd.f32 %v1178_v31, %v992_v30 }
 0x81c   :  { %v793_v33 = vpop.f32.mrf.mxu0 }
 0x81d   :  { %v794_v34 = vadd.f32 %v992_v30, %v793_v33  ;;  %v803_v36 = vmax.f32 %v799_v32, 0.0 }
 0x81f   :  { %v802_v35 = vmax.f32 %v794_v34, 0.0 }
 0x821   :  { %1211 = vmatprep.mubr.f32.mxu1 %v802_v35 }
 0x822   :  { %1212 = vmatmul.mubr.f32.vlgmr.msra.gmra.mxu1 %v803_v36 }
 0x8e2   :  { %v1213_v38 = vpop.f32.mrf.mxu1 }
 0x8e3   :  { %v897_v39 = vadd.f32 %v1213_v38, %v995_v37 }
 0x8e4   :  { %v891_v40 = vpop.f32.mrf.mxu1 }
 0x8e5   :  { %v892_v41 = vadd.f32 %v995_v37, %v891_v40  ;;  %v901_v42 = vadd.f32 %v897_v39, %v711_v25 }
 0x8e7   :  { %v907_v43 = vsel %vm587_vm5, %v901_v42, 0.0  ;;  %v900_v44 = vadd.f32 %v892_v41, %v710_v23 }
 0x8e8   :  { %908 = vadd.xlane.f32.xlu0 %v907_v43 }
 0x8e9   :  { %v904_v45 = vsel %vm587_vm5, %v900_v44, 0.0 }
 0x8ea   :  { %905 = vadd.xlane.f32.xlu1 %v904_v45 }
 0x971   :  { %v909_v46 = vpop.xlane.xlu0 %908 }
 0x972   :  { %v911_v47 = vmul.f32 0.03125, %v909_v46 }
 0x973   :  { %v906_v48 = vpop.xlane.xlu1 %905 }
 0x974   :  { %v913_v49 = vsub.f32 %v901_v42, %v911_v47  ;;  %v910_v50 = vmul.f32 0.03125, %v906_v48 }
 0x976   :  { %v912_v16 = vsub.f32 %v900_v44, %v910_v50  ;;  %v915_v51 = vmul.f32 %v913_v49, %v913_v49 }
 0x978   :  { %v919_v52 = vsel %vm587_vm5, %v915_v51, 0.0  ;;  %v914_v53 = vmul.f32 %v912_v16, %v912_v16 }
 0x979   :  { %920 = vadd.xlane.f32.xlu0 %v919_v52 }
 0x97a   :  { %v916_v13 = vsel %vm587_vm5, %v914_v53, 0.0 }
 0x97b   :  { %917 = vadd.xlane.f32.xlu1 %v916_v13 }
 0xa02   :  { %v921_v4 = vpop.xlane.xlu0 %920 }
 0xa03   :  { %v923_v54 = vmul.f32 0.03125, %v921_v4 }
 0xa04   :  { %v918_v55 = vpop.xlane.xlu1 %917 }
 0xa05   :  { %v925_v56 = vadd.f32 1e-05, %v923_v54  ;;  %v922_v57 = vmul.f32 0.03125, %v918_v55 }
 0xa07   :  { %1260 = vrsqrt.f32 %v925_v56  ;;  %v924_v58 = vadd.f32 1e-05, %v922_v57 }
 0xa09   :  { %1262 = vrsqrt.f32 %v924_v58 }
 0xa14   :  { %v1261_v59 = vpop.eup %1260 }
 0xa15   :  { %v929_v60 = vmul.f32 %v1261_v59, %v913_v49 }
 0xa16   :  { %v1263_v61 = vpop.eup %1262 }
 0xa17   :  { %v928_v63 = vmul.f32 %v1263_v61, %v912_v16  ;;  %v935_v0 = vmul.f32 %v996_v18, %v929_v60 }
 0xa19   :  { %v934_v1 = vmul.f32 %v996_v18, %v928_v63  ;;  %v941_v2 = vadd.f32 %v997_v62, %v935_v0 }
 0xa1b   :  { %v940_v3 = vadd.f32 %v997_v62, %v934_v1  ;;  %943 = vst.msk [vmem:[#allocation2 + $0x8] sm:$0xff] %vm587_vm5, %v941_v2 }
 0xa1d   :  { %942 = vst.msk [vmem:[#allocation2] sm:$0xff] %vm587_vm5, %v940_v3 }
 0xa1e   :  { %1275 = shalt.err (!%p1272_p4)
}
 0xa1f   :  { %s1295_s6 = smov 128  }
 0xa20   :  { %955 = dma.vmem_to_hbm [thread:$0]  %s950_s3, 256, %s1673_s7, [#allocation3], %s1295_s6, %s1295_s6, %s1291_s9  }
 0xa21   :  { %1284 = dma.done.wait [#allocation3], 256  }
 0xa22   :  { %1285 = vsyncadd [#allocation3], 4294967040 }
 0xa23   :  { %959 = vsyncpa [#allocation3], 1 }

</bundles_post_ra>
